<compile_context>
chip_gen: v6e
topology: v6e:2x2x1
jax: 0.10.0
libtpu: 0.0.40
codegen_flags: <defaults>
</compile_context>

<pallas_src>
import jax
import jax.numpy as jnp
from jax import lax
from jax.experimental import pallas as pl
from jax.experimental.pallas import tpu as pltpu


# ----------------------------------------------------------------------------- kernels

def core_kernel(x_ref, wbig_ref, bbig_ref, wfc_ref, bfc_ref, o_ref, acc_ref):
    # x: (B, 2D) bf16              wbig: (2D, TH) bf16   bbig: (1, TH) f32
    # wfc: (TH, D) bf16            bfc: (1, D) f32
    # o: (B, D) bf16               acc: (B, D) f32 VMEM scratch (resident across grid)
    k = pl.program_id(0)

    @pl.when(k == 0)
    def _():
        acc_ref[...] = jnp.zeros_like(acc_ref)

    feat = jnp.dot(x_ref[...], wbig_ref[...], preferred_element_type=jnp.float32)
    feat = jnp.maximum(feat + bbig_ref[...], 0.0)          # conv + folded BN0/BN1 + ReLU
    acc_ref[...] += jnp.dot(feat.astype(jnp.bfloat16), wfc_ref[...],
                            preferred_element_type=jnp.float32)

    @pl.when(k == pl.num_programs(0) - 1)
    def _():
        # fc bias + folded BN2 + ReLU; emit bf16 directly for the scoring matmul
        o_ref[...] = jnp.maximum(acc_ref[...] + bfc_ref[...], 0.0).astype(o_ref.dtype)


def score_kernel(t_ref, e_ref, b_ref, o_ref):
    # t: (B, D) bf16   e: (TN, D) bf16   b: (1, TN) f32   o: (B, TN) f32
    logits = lax.dot_general(
        t_ref[...], e_ref[...],
        dimension_numbers=(((1,), (1,)), ((), ())),        # t @ e.T without materializing E.T
        preferred_element_type=jnp.float32)
    o_ref[...] = jax.nn.sigmoid(logits + b_ref[...])


# ----------------------------------------------------------------------------- host-side folding

def fold_bn(gamma, beta, mean, var, eps=1e-5):
    s = gamma / jnp.sqrt(var + eps)
    t = beta - mean * s
    return s, t


def build_lowered_conv(conv_w, conv_b, s0, t0, g1, b1, Hin, Win):
    """Lower the 3x3 VALID conv (+BN0 input affine, +conv bias, +BN1 affine) to one matmul.

    Returns W_big (Hin*Win, C*OH*OW) and bias_big (1, C*OH*OW) such that
        relu(x_flat @ W_big + bias_big) == relu(BN1(conv(BN0(x)))) flattened in NCHW order,
    where x_flat is the raw (B, Hin*Win) concatenated embedding image.
    """
    C, _, KH, KW = conv_w.shape
    OH, OW = Hin - KH + 1, Win - KW + 1
    w5 = jnp.zeros((Hin, Win, C, OH, OW), jnp.float32)
    for kh in range(KH):
        ih_sel = jnp.zeros((Hin, OH), jnp.float32).at[
            jnp.arange(OH) + kh, jnp.arange(OH)].set(1.0)
        for kw in range(KW):
            iw_sel = jnp.zeros((Win, OW), jnp.float32).at[
                jnp.arange(OW) + kw, jnp.arange(OW)].set(1.0)
            w5 = w5 + jnp.einsum('ho,wp,c->hwcop', ih_sel, iw_sel, conv_w[:, 0, kh, kw])
    scale = (s0 * g1).astype(jnp.float32)                       # (C,)
    w5 = w5 * scale[None, None, :, None, None]
    w_big = w5.reshape(Hin * Win, C * OH * OW)                  # columns already (c, oh, ow)

    tap_sum = conv_w[:, 0].sum(axis=(1, 2))                     # (C,)
    bias_c = g1 * (t0 * tap_sum + conv_b) + b1                  # (C,)
    b_big = jnp.broadcast_to(bias_c[:, None, None], (C, OH, OW)).reshape(1, C * OH * OW)
    return w_big, b_big


def _round_to_128(n, requested):
    m = min(requested, ((n + 127) // 128) * 128)
    return max(128, (m // 128) * 128)


def prepare_conve_params(params, img_h=10, hidden_tile=2048, score_tile=2048):
    """One-time host-side preparation: BN folding, conv lowering, bf16 casts, tile padding.

    Done once (NOT per forward call) so the multi-MB lowering einsums never sit on the
    per-call critical path.
    """
    E, R = params["E"], params["R"]
    N_ent, D = E.shape
    img_w = D // img_h
    Hin, Win = 2 * img_h, img_w

    s0, t0 = fold_bn(params["bn0_g"], params["bn0_b"], params["bn0_m"], params["bn0_v"])
    g1, b1 = fold_bn(params["bn1_g"], params["bn1_b"], params["bn1_m"], params["bn1_v"])
    g2, b2 = fold_bn(params["bn2_g"], params["bn2_b"], params["bn2_m"], params["bn2_v"])

    w_big, b_big = build_lowered_conv(params["conv_w"], params["conv_b"],
                                      s0, t0, g1, b1, Hin, Win)      # (2D, hidden), (1, hidden)
    w_fc = params["fc_w"] * g2[None, :]                              # (hidden, D)
    b_fc = (params["fc_b"] * g2 + b2).reshape(1, D)                  # (1, D)

    # ---- pad the hidden dim to a multiple of the streaming tile TH (zero cols/rows: no-op) ----
    hidden = w_big.shape[1]
    TH = _round_to_128(hidden, hidden_tile)
    n_h = -(-hidden // TH)
    hidden_pad = n_h * TH
    if hidden_pad != hidden:
        w_big = jnp.pad(w_big, ((0, 0), (0, hidden_pad - hidden)))
        b_big = jnp.pad(b_big, ((0, 0), (0, hidden_pad - hidden)))
        w_fc = jnp.pad(w_fc, ((0, hidden_pad - hidden), (0, 0)))

    # ---- pad the entity dim to a multiple of the scoring tile TN ----
    TN = _round_to_128(N_ent, score_tile)
    n_e = -(-N_ent // TN)
    N_pad = n_e * TN
    E_s = E.astype(jnp.bfloat16)
    b_s = params["b"].reshape(1, N_ent).astype(jnp.float32)
    if N_pad != N_ent:
        E_s = jnp.pad(E_s, ((0, N_pad - N_ent), (0, 0)))
        b_s = jnp.pad(b_s, ((0, 0), (0, N_pad - N_ent)))

    return {
        "E": E, "R": R,
        "w_big": w_big.astype(jnp.bfloat16),   # bf16 weights: half the HBM bytes (f32 accumulate)
        "b_big": b_big.astype(jnp.float32),
        "w_fc": w_fc.astype(jnp.bfloat16),
        "b_fc": b_fc.astype(jnp.float32),
        "E_s": E_s, "b_s": b_s,
        "D": int(D), "N_ent": int(N_ent), "N_pad": int(N_pad),
        "TH": int(TH), "n_h": int(n_h), "TN": int(TN), "n_e": int(n_e),
        "img_h": int(img_h),
    }


# ----------------------------------------------------------------------------- forward

def conve_forward(h_idx, r_idx, prep):
    E, R = prep["E"], prep["R"]
    D, TH, TN = prep["D"], prep["TH"], prep["TN"]
    n_h, n_e = prep["n_h"], prep["n_e"]
    N_ent, N_pad = prep["N_ent"], prep["N_pad"]
    two_d = 2 * D

    h = jnp.take(E, h_idx, axis=0)                   # (B, D)
    r = jnp.take(R, r_idx, axis=0)                   # (B, D)
    B = h.shape[0]
    # concat along image-H then flatten row-major == plain feature concat
    x_flat = jnp.concatenate([h, r], axis=1).astype(jnp.bfloat16)    # (B, 2D)

    # ---- kernel 1: fused conv-as-matmul + FC path, streamed over the hidden dim ----
    t = pl.pallas_call(
        core_kernel,
        out_shape=jax.ShapeDtypeStruct((B, D), jnp.bfloat16),
        grid=(n_h,),
        in_specs=[
            pl.BlockSpec((B, two_d), lambda k: (0, 0)),    # x (resident)
            pl.BlockSpec((two_d, TH), lambda k: (0, k)),   # streamed w_big column tile
            pl.BlockSpec((1, TH), lambda k: (0, k)),       # streamed conv/BN bias tile
            pl.BlockSpec((TH, D), lambda k: (k, 0)),       # streamed w_fc row tile
            pl.BlockSpec((1, D), lambda k: (0, 0)),        # fc/BN2 bias (resident)
        ],
        out_specs=pl.BlockSpec((B, D), lambda k: (0, 0)),  # resident output (finalized at last step)
        scratch_shapes=[pltpu.VMEM((B, D), jnp.float32)],  # f32 accumulator
        compiler_params=pltpu.CompilerParams(
            dimension_semantics=("arbitrary",)),           # hidden axis is a reduction
    )(x_flat, prep["w_big"], prep["b_big"], prep["w_fc"], prep["b_fc"])

    # ---- kernel 2: entity-tiled bf16 scoring matmul ----
    out = pl.pallas_call(
        score_kernel,
        out_shape=jax.ShapeDtypeStruct((B, N_pad), jnp.float32),
        grid=(n_e,),
        in_specs=[pl.BlockSpec((B, D), lambda n: (0, 0)),          # t (resident, already bf16)
                  pl.BlockSpec((TN, D), lambda n: (n, 0)),         # streamed E tile
                  pl.BlockSpec((1, TN), lambda n: (0, n))],        # bias tile
        out_specs=pl.BlockSpec((B, TN), lambda n: (0, n)),         # lane-dense output tile
        compiler_params=pltpu.CompilerParams(
            dimension_semantics=("parallel",),                     # shard entity tiles across TCs (v7x)
            vmem_limit_bytes=32 * 1024 * 1024),
    )(t, prep["E_s"], prep["b_s"])

    return out[:, :N_ent] if N_pad != N_ent else out


# ----------------------------------------------------------------------------- reference (pure JAX, f32)

def conve_reference(h_idx, r_idx, params, img_h=10):
    E, R = params["E"], params["R"]
    D = E.shape[1]
    img_w = D // img_h
    h = jnp.take(E, h_idx, axis=0)
    r = jnp.take(R, r_idx, axis=0)
    B = h.shape[0]
    x = jnp.concatenate([h.reshape(B, 1, img_h, img_w),
                         r.reshape(B, 1, img_h, img_w)], axis=2)     # NCHW
    s0, t0 = fold_bn(params["bn0_g"], params["bn0_b"], params["bn0_m"], params["bn0_v"])
    x = x * s0 + t0
    y = lax.conv_general_dilated(x, params["conv_w"], (1, 1), "VALID",
                                 dimension_numbers=("NCHW", "OIHW", "NCHW"))
    y = y + params["conv_b"].reshape(1, 32, 1, 1)
    g1, b1 = fold_bn(params["bn1_g"], params["bn1_b"], params["bn1_m"], params["bn1_v"])
    y = jnp.maximum(y * g1.reshape(1, 32, 1, 1) + b1.reshape(1, 32, 1, 1), 0.0)
    y = y.reshape(B, -1)
    y = y @ params["fc_w"] + params["fc_b"]
    g2, b2 = fold_bn(params["bn2_g"], params["bn2_b"], params["bn2_m"], params["bn2_v"])
    t = jnp.maximum(y * g2 + b2, 0.0)
    return jax.nn.sigmoid(t @ E.T + params["b"])


# ----------------------------------------------------------------------------- main

if __name__ == "__main__":
    # Small, forward-consistent shapes: embedding_dim=40 -> img 10x4, concat 20x4,
    # conv out 18x2x32 -> hidden 1152.  num_entities=300 exercises both the multi-tile
    # scoring grid and the remainder-padding path.
    num_entities, num_relations = 300, 16
    embedding_dim, img_h = 40, 10
    img_w = embedding_dim // img_h
    hidden = (img_h * 2 - 2) * (img_w - 2) * 32
    batch = 8

    key = jax.random.PRNGKey(0)
    ks = jax.random.split(key, 16)
    f32 = jnp.float32

    params = {
        "E": jax.random.normal(ks[0], (num_entities, embedding_dim), f32) * 0.1,
        "R": jax.random.normal(ks[1], (num_relations, embedding_dim), f32) * 0.1,
        "conv_w": jax.random.normal(ks[2], (32, 1, 3, 3), f32) * 0.2,      # OIHW
        "conv_b": jax.random.normal(ks[3], (32,), f32) * 0.05,
        "fc_w": jax.random.normal(ks[4], (hidden, embedding_dim), f32) * 0.05,
        "fc_b": jax.random.normal(ks[5], (embedding_dim,), f32) * 0.05,
        "b": jax.random.normal(ks[6], (num_entities,), f32) * 0.05,
        # BatchNorm (eval-mode) parameters: gamma, beta, running_mean, running_var
        "bn0_g": 1.0 + 0.1 * jax.random.normal(ks[7], (1,), f32),
        "bn0_b": 0.1 * jax.random.normal(ks[8], (1,), f32),
        "bn0_m": 0.05 * jax.random.normal(ks[9], (1,), f32),
        "bn0_v": 1.0 + jnp.abs(0.1 * jax.random.normal(ks[10], (1,), f32)),
        "bn1_g": 1.0 + 0.1 * jax.random.normal(ks[11], (32,), f32),
        "bn1_b": 0.1 * jax.random.normal(ks[12], (32,), f32),
        "bn1_m": 0.05 * jax.random.normal(ks[13], (32,), f32),
        "bn1_v": 1.0 + jnp.abs(0.1 * jax.random.normal(ks[14], (32,), f32)),
        "bn2_g": jnp.ones((embedding_dim,), f32) * 1.05,
        "bn2_b": jnp.full((embedding_dim,), 0.02, f32),
        "bn2_m": jnp.full((embedding_dim,), 0.01, f32),
        "bn2_v": jnp.ones((embedding_dim,), f32) * 0.9,
    }

    h_idx = jax.random.randint(ks[15], (batch,), 0, num_entities, dtype=jnp.int32)
    r_idx = jax.random.randint(jax.random.fold_in(key, 99), (batch,), 0, num_relations,
                               dtype=jnp.int32)

    # One-time preparation (BN folding, conv lowering, bf16 casts, tile padding).
    # Real-size defaults are hidden_tile=2048 / score_tile=2048; the small tiles here are
    # only to exercise the multi-tile streaming grids + padding paths at toy shapes.
    prep = prepare_conve_params(params, img_h=img_h, hidden_tile=512, score_tile=256)

    out = conve_forward(h_idx, r_idx, prep)
    out = jax.block_until_ready(out)

    ref = jax.block_until_ready(conve_reference(h_idx, r_idx, params, img_h=img_h))
    assert out.shape == (batch, num_entities)
    # end-to-end bf16 operands (f32 accumulation everywhere) -> looser tolerance than pure f32
    assert jnp.allclose(out, ref, atol=1e-2, rtol=0.0), float(jnp.max(jnp.abs(out - ref)))

    print("KERNEL_OK")
</pallas_src>

<mosaic_0001>
module attributes {stable_mosaic.version = 11 : i64} {
  func.func @core_kernel(%arg0: i32, %arg1: memref<8x80xbf16, #tpu.memory_space<vmem>>, %arg2: memref<80x512xbf16, #tpu.memory_space<vmem>>, %arg3: memref<1x512xf32, #tpu.memory_space<vmem>>, %arg4: memref<512x40xbf16, #tpu.memory_space<vmem>>, %arg5: memref<1x40xf32, #tpu.memory_space<vmem>>, %arg6: memref<8x40xbf16, #tpu.memory_space<vmem>>, %arg7: memref<8x40xf32, #tpu.memory_space<vmem>>) attributes {dimension_semantics = [#tpu.dimension_semantics<arbitrary>], iteration_bounds = array<i64: 3>, scalar_prefetch = 0 : i64, scratch_operands = 1 : i64, tpu.core_type = #tpu.core_type<tc>, window_params = [{pipeline_mode = #tpu.pipeline_mode<synchronous>, transform_indices = @transform_0, window_bounds = array<i64: 8, 80>}, {transform_indices = @transform_1, window_bounds = array<i64: 80, 512>}, {transform_indices = @transform_2, window_bounds = array<i64: 1, 512>}, {transform_indices = @transform_3, window_bounds = array<i64: 512, 40>}, {pipeline_mode = #tpu.pipeline_mode<synchronous>, transform_indices = @transform_4, window_bounds = array<i64: 1, 40>}, {pipeline_mode = #tpu.pipeline_mode<synchronous>, transform_indices = @transform_5, window_bounds = array<i64: 8, 40>}]} {
    %c0_i32 = arith.constant 0 : i32
    %0 = arith.cmpi eq, %arg0, %c0_i32 : i32
    %1 = arith.extui %0 : i1 to i32
    %c0_i32_0 = arith.constant 0 : i32
    %2 = arith.cmpi ne, %1, %c0_i32_0 : i32
    scf.if %2 {
      %cst_15 = arith.constant 0.000000e+00 : f32
      %20 = vector.broadcast %cst_15 : f32 to vector<8x40xf32>
      %c0_16 = arith.constant 0 : index
      %c0_17 = arith.constant 0 : index
      %21 = vector.load %arg7[%c0_16, %c0_17] : memref<8x40xf32, #tpu.memory_space<vmem>>, vector<8x40xf32>
      tpu.vector_store %arg7[%c0_16, %c0_17], %20 {strides = array<i32>} : memref<8x40xf32, #tpu.memory_space<vmem>>, vector<8x40xf32>,
    } else {
    }
    %c0 = arith.constant 0 : index
    %c0_1 = arith.constant 0 : index
    %3 = vector.load %arg1[%c0, %c0_1] : memref<8x80xbf16, #tpu.memory_space<vmem>>, vector<8x80xbf16>
    %c0_2 = arith.constant 0 : index
    %c0_3 = arith.constant 0 : index
    %4 = vector.load %arg2[%c0_2, %c0_3] : memref<80x512xbf16, #tpu.memory_space<vmem>>, vector<80x512xbf16>
    %cst = arith.constant dense<0.000000e+00> : vector<8x512xf32>
    %5 = tpu.matmul %3, %4, %cst {dimension_numbers = #tpu.dot_dimension_numbers<[1], [0], [0], [1], [0, 0, 1, 1], [], []>} : vector<8x80xbf16>, vector<80x512xbf16>, vector<8x512xf32> -> vector<8x512xf32>
    %c0_4 = arith.constant 0 : index
    %c0_5 = arith.constant 0 : index
    %6 = vector.load %arg3[%c0_4, %c0_5] : memref<1x512xf32, #tpu.memory_space<vmem>>, vector<1x512xf32>
    %7 = vector.broadcast %6 : vector<1x512xf32> to vector<8x512xf32>
    %8 = arith.addf %5, %7 : vector<8x512xf32>
    %cst_6 = arith.constant 0.000000e+00 : f32
    %9 = vector.broadcast %cst_6 : f32 to vector<8x512xf32>
    %10 = arith.maximumf %8, %9 : vector<8x512xf32>
    %c0_7 = arith.constant 0 : index
    %c0_8 = arith.constant 0 : index
    %11 = vector.load %arg7[%c0_7, %c0_8] : memref<8x40xf32, #tpu.memory_space<vmem>>, vector<8x40xf32>
    %12 = arith.truncf %10 : vector<8x512xf32> to vector<8x512xbf16>
    %c0_9 = arith.constant 0 : index
    %c0_10 = arith.constant 0 : index
    %13 = vector.load %arg4[%c0_9, %c0_10] : memref<512x40xbf16, #tpu.memory_space<vmem>>, vector<512x40xbf16>
    %cst_11 = arith.constant dense<0.000000e+00> : vector<8x40xf32>
    %14 = tpu.matmul %12, %13, %cst_11 {dimension_numbers = #tpu.dot_dimension_numbers<[1], [0], [0], [1], [0, 0, 1, 1], [], []>} : vector<8x512xbf16>, vector<512x40xbf16>, vector<8x40xf32> -> vector<8x40xf32>
    %15 = arith.addf %11, %14 : vector<8x40xf32>
    %c0_12 = arith.constant 0 : index
    %c0_13 = arith.constant 0 : index
    %16 = vector.load %arg7[%c0_12, %c0_13] : memref<8x40xf32, #tpu.memory_space<vmem>>, vector<8x40xf32>
    tpu.vector_store %arg7[%c0_12, %c0_13], %15 {strides = array<i32>} : memref<8x40xf32, #tpu.memory_space<vmem>>, vector<8x40xf32>,
    %c2_i32 = arith.constant 2 : i32
    %17 = arith.cmpi eq, %arg0, %c2_i32 : i32
    %18 = arith.extui %17 : i1 to i32
    %c0_i32_14 = arith.constant 0 : i32
    %19 = arith.cmpi ne, %18, %c0_i32_14 : i32
    scf.if %19 {
      %c0_15 = arith.constant 0 : index
      %c0_16 = arith.constant 0 : index
      %20 = vector.load %arg7[%c0_15, %c0_16] : memref<8x40xf32, #tpu.memory_space<vmem>>, vector<8x40xf32>
      %c0_17 = arith.constant 0 : index
      %c0_18 = arith.constant 0 : index
      %21 = vector.load %arg5[%c0_17, %c0_18] : memref<1x40xf32, #tpu.memory_space<vmem>>, vector<1x40xf32>
      %22 = vector.broadcast %21 : vector<1x40xf32> to vector<8x40xf32>
      %23 = arith.addf %20, %22 : vector<8x40xf32>
      %cst_19 = arith.constant 0.000000e+00 : f32
      %24 = vector.broadcast %cst_19 : f32 to vector<8x40xf32>
      %25 = arith.maximumf %23, %24 : vector<8x40xf32>
      %26 = arith.truncf %25 : vector<8x40xf32> to vector<8x40xbf16>
      %c0_20 = arith.constant 0 : index
      %c0_21 = arith.constant 0 : index
      %27 = vector.load %arg6[%c0_20, %c0_21] : memref<8x40xbf16, #tpu.memory_space<vmem>>, vector<8x40xbf16>
      tpu.vector_store %arg6[%c0_20, %c0_21], %26 {strides = array<i32>} : memref<8x40xbf16, #tpu.memory_space<vmem>>, vector<8x40xbf16>,
    } else {
    }
    return
  }
  func.func @transform_0(%arg0: i32) -> (i32, i32) {
    %c0_i32 = arith.constant 0 : i32
    %c0_i32_0 = arith.constant 0 : i32
    %c0_i32_1 = arith.constant 0 : i32
    return %c0_i32, %c0_i32_0 : i32, i32
  }
  func.func @transform_1(%arg0: i32) -> (i32, i32) {
    %c0_i32 = arith.constant 0 : i32
    %c0_i32_0 = arith.constant 0 : i32
    return %c0_i32, %arg0 : i32, i32
  }
  func.func @transform_2(%arg0: i32) -> (i32, i32) {
    %c0_i32 = arith.constant 0 : i32
    %c0_i32_0 = arith.constant 0 : i32
    return %c0_i32, %arg0 : i32, i32
  }
  func.func @transform_3(%arg0: i32) -> (i32, i32) {
    %c0_i32 = arith.constant 0 : i32
    %c0_i32_0 = arith.constant 0 : i32
    return %arg0, %c0_i32 : i32, i32
  }
  func.func @transform_4(%arg0: i32) -> (i32, i32) {
    %c0_i32 = arith.constant 0 : i32
    %c0_i32_0 = arith.constant 0 : i32
    %c0_i32_1 = arith.constant 0 : i32
    return %c0_i32, %c0_i32_0 : i32, i32
  }
  func.func @transform_5(%arg0: i32) -> (i32, i32) {
    %c0_i32 = arith.constant 0 : i32
    %c0_i32_0 = arith.constant 0 : i32
    %c0_i32_1 = arith.constant 0 : i32
    return %c0_i32, %c0_i32_0 : i32, i32
  }
}

</mosaic_0001>

<bundles_post_ra>
// kernel: tpu_custom_call.1
= control target key start
LH: loop header
LB: loop body
LE: loop exit
PB: predicated region body
PF: predicated region fallthrough
CT: control target
= control target key end

     0   :  { %10 = vsyncpa [#allocation5], 0  ;;  %s1282_s18 = smov 0   ;;  %s1284_s19 = smov 0   ;;  %s1467_s0 = inlined_call_operand.vmem [shape: bf16[8,80], index: 0, kind: input, shape index: {}]   ;;  %s1468_s1 = inlined_call_operand.vmem [shape: bf16[80,1536], index: 1, kind: input, shape index: {}]   ;;  %s1469_s2 = inlined_call_operand.vmem [shape: f32[1,1536], index: 2, kind: input, shape index: {}]   ;;  %s1470_s3 = inlined_call_operand.vmem [shape: bf16[1536,40], index: 3, kind: input, shape index: {}]   ;;  %s1471_s4 = inlined_call_operand.vmem [shape: f32[1,40], index: 4, kind: input, shape index: {}]   ;;  %s1472_s5 = inlined_call_operand.hbm [shape: bf16[8,40], index: 5, kind: output, shape index: {}]  }
   0x1   :  { %s1286_s20 = smov 0  }
   0x2 LB: > { %s1298_s21 = sadd.s32 4294967295, %s1247_s20   ;;  %s1301_s22 = sadd.s32 1, %s1247_s20   ;;  %s1247_s20 = sphi %s1286_s20, %s1475_s20   ;;  %s1243_s19 = sphi %s1284_s19, %s1474_s19   ;;  %s1239_s18 = sphi %s1282_s18, %s1473_s18  }
   0x3   : > { %s41_s23 = ssub.s32 %s1247_s20, %s1301_s22  ;;  %s44_s24 = sadd.s32 1, %s1243_s19 }
   0x4   : > { %p42_p0 = scmp.eq.s32.totalorder %s41_s23, 0  ;;  %p51_p1 = scmp.ne.s32.totalorder %s1243_s19, %s1239_s18 }
   0x5   : > { %p52_p2 = scmp.eq.s32.totalorder %s1247_s20, 0  ;;  %p987_p4 = scmp.ge.s32.totalorder %s1247_s20, 3 }
   0x6   : > { %s1310_s25 = scalar_select %p42_p0, %s1243_s19, %s44_s24  }
   0x7   : > { %p53_p3 = por %p52_p2, %p51_p1  ;;  %177 = sbr.rel (%p987_p4) target bundleno = 27 (0x1b), region = 24 }
   0xc   : > { %180 = sbr.rel (!%p53_p3) target bundleno = 27 (0x1b), region = 28  ;;  %s182_s26 = sand.u32 (%p53_p3), 1, %s1243_s19  }
   0xd   : > { %s1055_s27 = sshll.u32 (%p53_p3), %s1247_s20, 4  ;;  %s1100_s28 = smul.u32 (%p53_p3), 160, %s182_s26 }
   0xe   : > { %s1318_s6 = scalar_lea.vmem (%p53_p3), %s1468_s1, %s1055_s27 }
   0xf   : > { %v200_v0 = vld [vmem:[%s1318_s6] sm:$0xff] (%p53_p3)  ;;  %v202_v1 = vld [vmem:[%s1318_s6 + $0x8] sm:$0xff] (%p53_p3)  ;;  %v204_v2 = vld [vmem:[%s1318_s6 + $0x30] sm:$0xff] (%p53_p3)  ;;  %s1326_s7 = scalar_lea.vmem (%p53_p3), [#allocation3], %s1100_s28 }
  0x10   : > { %v206_v3 = vld [vmem:[%s1318_s6 + $0x38] sm:$0xff] (%p53_p3)  ;;  %v208_v4 = vld [vmem:[%s1318_s6 + $0x60] sm:$0xff] (%p53_p3)  ;;  %v210_v5 = vld [vmem:[%s1318_s6 + $0x68] sm:$0xff] (%p53_p3)  ;;  %201 = vst [vmem:[%s1326_s7] sm:$0xff] (%p53_p3), %v200_v0 }
  0x11   : > { %203 = vst [vmem:[%s1326_s7 + $0x8] sm:$0xff] %v202_v1  ;;  %205 = vst [vmem:[%s1326_s7 + $0x10] sm:$0xff] %v204_v2  ;;  %v212_v6 = vld [vmem:[%s1318_s6 + $0x90] sm:$0xff]  ;;  %v214_v7 = vld [vmem:[%s1318_s6 + $0x98] sm:$0xff] }
  0x12   : > { %207 = vst [vmem:[%s1326_s7 + $0x18] sm:$0xff] %v206_v3  ;;  %209 = vst [vmem:[%s1326_s7 + $0x20] sm:$0xff] %v208_v4  ;;  %v216_v8 = vld [vmem:[%s1318_s6 + $0xc0] sm:$0xff]  ;;  %v218_v9 = vld [vmem:[%s1318_s6 + $0xc8] sm:$0xff] }
  0x13   : > { %211 = vst [vmem:[%s1326_s7 + $0x28] sm:$0xff] %v210_v5  ;;  %213 = vst [vmem:[%s1326_s7 + $0x30] sm:$0xff] %v212_v6  ;;  %v220_v10 = vld [vmem:[%s1318_s6 + $0xf0] sm:$0xff]  ;;  %v222_v11 = vld [vmem:[%s1318_s6 + $0xf8] sm:$0xff] }
  0x14   : > { %215 = vst [vmem:[%s1326_s7 + $0x38] sm:$0xff] %v214_v7  ;;  %217 = vst [vmem:[%s1326_s7 + $0x40] sm:$0xff] %v216_v8  ;;  %v224_v12 = vld [vmem:[%s1318_s6 + $0x120] sm:$0xff]  ;;  %v226_v13 = vld [vmem:[%s1318_s6 + $0x128] sm:$0xff] }
  0x15   : > { %219 = vst [vmem:[%s1326_s7 + $0x48] sm:$0xff] %v218_v9  ;;  %221 = vst [vmem:[%s1326_s7 + $0x50] sm:$0xff] %v220_v10  ;;  %v228_v14 = vld [vmem:[%s1318_s6 + $0x150] sm:$0xff]  ;;  %v230_v15 = vld [vmem:[%s1318_s6 + $0x158] sm:$0xff] }
  0x16   : > { %223 = vst [vmem:[%s1326_s7 + $0x58] sm:$0xff] %v222_v11  ;;  %225 = vst [vmem:[%s1326_s7 + $0x60] sm:$0xff] %v224_v12  ;;  %v232_v16 = vld [vmem:[%s1318_s6 + $0x180] sm:$0xff]  ;;  %v234_v17 = vld [vmem:[%s1318_s6 + $0x188] sm:$0xff] }
  0x17   : > { %227 = vst [vmem:[%s1326_s7 + $0x68] sm:$0xff] %v226_v13  ;;  %229 = vst [vmem:[%s1326_s7 + $0x70] sm:$0xff] %v228_v14  ;;  %v236_v18 = vld [vmem:[%s1318_s6 + $0x1b0] sm:$0xff]  ;;  %v238_v19 = vld [vmem:[%s1318_s6 + $0x1b8] sm:$0xff] }
  0x18   : > { %231 = vst [vmem:[%s1326_s7 + $0x78] sm:$0xff] %v230_v15  ;;  %233 = vst [vmem:[%s1326_s7 + $0x80] sm:$0xff] %v232_v16 }
  0x19   : > { %235 = vst [vmem:[%s1326_s7 + $0x88] sm:$0xff] %v234_v17  ;;  %237 = vst [vmem:[%s1326_s7 + $0x90] sm:$0xff] %v236_v18 }
  0x1a   : > { %239 = vst [vmem:[%s1326_s7 + $0x98] sm:$0xff] %v238_v19 }
  0x1b PF: > { %p990_p5 = scmp.ge.s32.totalorder %s1247_s20, 1  ;;  %p261_p6 = scmp.lt.s32.totalorder %s1247_s20, 4 }
  0x1d   : > { %p262_p7 = pnand %p990_p5, %p261_p6 }
  0x1e   : > { %s268_s8 = sand.u32 (!%p262_p7), 1, %s1239_s18   ;;  %s991_s9 = sshll.u32 (!%p262_p7), %s1298_s21, 2 }
  0x1f   : > { %265 = sbr.rel (%p262_p7) target bundleno = 500 (0x1f4), region = 59  ;;  %p301_p8 = scmp.lt.s32.totalorder (!%p262_p7), %s991_s9, 11 }
  0x20   : > { %s1101_s10 = smul.u32 (!%p262_p7), 160, %s268_s8  ;;  %s992_s11 = sshll.u32 (!%p262_p7), %s1298_s21, 6 }
  0x21   : > { %p306_p9 = scmp.lt.s32.totalorder (!%p262_p7), %s992_s11, 191  ;;  %p994_p10 = scmp.ne.s32.totalorder (!%p262_p7), %s1298_s21, 0 }
  0x22   : > { %s1378_s18 = scalar_lea.vmem (!%p262_p7), [#allocation3], %s1101_s10 }
  0x24   : > { %s1477_s9 = smov (!%p301_p8, %s991_s9), 11  ;;  %s1479_s11 = smov (!%p306_p9, %s992_s11), 191 }
  0x25   : > { %s303_s14 = scalar_lea.vmem %s1469_s2, %s1477_s9  ;;  %s993_s15 = sshll.u32 %s1479_s11, 2 }
  0x26   : > { %s1376_s20 = scalar_lea.vmem %s1470_s3, %s993_s15  ;;  %315 = sbr.rel (%p994_p10) target bundleno = 45 (0x2d), region = 67 }
  0x2b   : > { %vm316_vm0 = vcmask 326656   ;;  %v1249_v20 = vmov 0.0  }
  0x2c   : > { %317 = vst.msk [vmem:[#allocation2] sm:$0xff] %vm316_vm0, %v1249_v20 }
  0x2d PF: > { %v1135_v21 = vld [vmem:[%s1378_s18 + $0x84] ss:$16 sps:$4 sm:$0xff]   ;;  %v1137_v22 = vld [vmem:[%s1378_s18 + $0x8c] ss:$16 sps:$4 sm:$0xff]   ;;  %v1250_v23 = vmov 0   ;;  %vm461_vm1 = vcmask 654336   ;;  %v341_v11 = vlaneseq }
  0x2e   : > { %497 = vmatprep.mubr.bf16.mxu0 %v1250_v23  ;;  %538 = vmatprep.mubr.bf16.mxu1 %v1250_v23  ;;  %v1139_v24 = vld [vmem:[%s1378_s18 + $0x80] ss:$16 sps:$4 sm:$0xff]   ;;  %v1140_v25 = vld [vmem:[%s1378_s18 + $0x88] ss:$16 sps:$4 sm:$0xff]   ;;  %v1141_v26 = vld [vmem:[%s1378_s18 + $0x64] ss:$16 sps:$4 sm:$0xff]  }
  0x2f   : > { %471 = vmatprep.subr.bf16.mxu0 %v1135_v21  ;;  %512 = vmatprep.subr.bf16.mxu1 %v1137_v22  ;;  %v1143_v27 = vld [vmem:[%s1378_s18 + $0x6c] ss:$16 sps:$4 sm:$0xff]   ;;  %v1145_v28 = vld [vmem:[%s1378_s18 + $0x60] ss:$16 sps:$4 sm:$0xff]   ;;  %v1146_v29 = vld [vmem:[%s1378_s18 + $0x68] ss:$16 sps:$4 sm:$0xff]  }
  0x30   : > { %472 = vmatpush1.bf16.msra.mxu0 %v1139_v24  ;;  %513 = vmatpush1.bf16.msra.mxu1 %v1140_v25  ;;  %v1147_v30 = vld [vmem:[%s1378_s18 + $0x44] ss:$16 sps:$4 sm:$0xff]   ;;  %v1149_v31 = vld [vmem:[%s1378_s18 + $0x4c] ss:$16 sps:$4 sm:$0xff]   ;;  %v1151_v32 = vld [vmem:[%s1378_s18 + $0x40] ss:$16 sps:$4 sm:$0xff]  }
  0x31   : > { %473 = vmatprep.subr.bf16.mxu0 %v1141_v26  ;;  %514 = vmatprep.subr.bf16.mxu1 %v1143_v27  ;;  %v1152_v33 = vld [vmem:[%s1378_s18 + $0x48] ss:$16 sps:$4 sm:$0xff]   ;;  %v1153_v34 = vld [vmem:[%s1378_s18 + $0x24] ss:$16 sps:$4 sm:$0xff]   ;;  %v1155_v35 = vld [vmem:[%s1378_s18 + $0x2c] ss:$16 sps:$4 sm:$0xff]  }
  0x32   : > { %v1157_v36 = vld [vmem:[%s1378_s18 + $0x20] ss:$16 sps:$4 sm:$0xff]   ;;  %v1158_v37 = vld [vmem:[%s1378_s18 + $0x28] ss:$16 sps:$4 sm:$0xff]   ;;  %v1159_v38 = vld [vmem:[%s1378_s18 + $0x4] ss:$16 sps:$4 sm:$0xff]  }
  0x33   : > { %v1161_v39 = vld [vmem:[%s1378_s18 + $0xc] ss:$16 sps:$4 sm:$0xff]   ;;  %v1163_v40 = vld [vmem:[%s1378_s18] ss:$16 sps:$4 sm:$0xff]   ;;  %v1164_v41 = vld [vmem:[%s1378_s18 + $0x8] ss:$16 sps:$4 sm:$0xff]  }
  0x34   : > { %474 = vmatpush1.bf16.msra.mxu0 %v1145_v28  ;;  %515 = vmatpush1.bf16.msra.mxu1 %v1146_v29  ;;  %v1165_v42 = vld [vmem:[%s1376_s20 + $0x78] sm:$0xff]   ;;  %v318_v44 = vld [vmem:[%s1467_s0] sm:$0xf]  ;;  %v1169_v47 = vld [vmem:[%s1376_s20 + $0x70] sm:$0xff]   ;;  %v342_v12 = vshrl.u32 %v341_v11, 7  ;;  %vm893_vm2 = vcmask 326656  }
  0x35   : > { %475 = vmatprep.subr.bf16.mxu0 %v1147_v30  ;;  %516 = vmatprep.subr.bf16.mxu1 %v1149_v31  ;;  %v1166_v43 = vld [vmem:[%s1376_s20 + $0xf8] sm:$0xff]   ;;  %v1170_v48 = vld [vmem:[%s1376_s20 + $0xf0] sm:$0xff]   ;;  %v1173_v51 = vld [vmem:[%s1376_s20 + $0x68] sm:$0xff]   ;;  %p1049_p11 = scmp.ne.s32.totalorder %s1298_s21, 2 }
  0x36   : > { %v1167_v45 = vld [vmem:[%s1376_s20 + $0x38] sm:$0xff]   ;;  %v1171_v49 = vld [vmem:[%s1376_s20 + $0x30] sm:$0xff]   ;;  %v1174_v52 = vld [vmem:[%s1376_s20 + $0xe8] sm:$0xff]   ;;  %v343_v13 = vsub.s32 0, %v342_v12  ;;  %v351_v14 = vsub.s32 2, %v342_v12  ;;  %v347_v16 = vsub.s32 1, %v342_v12 }
  0x37   : > { %v1168_v46 = vld [vmem:[%s1376_s20 + $0xb8] sm:$0xff]   ;;  %v1172_v50 = vld [vmem:[%s1376_s20 + $0xb0] sm:$0xff]   ;;  %v1175_v53 = vld [vmem:[%s1376_s20 + $0x28] sm:$0xff]   ;;  %v355_v17 = vsub.s32 3, %v342_v12 }
  0x38   : > { %476 = vmatpush1.bf16.msra.mxu0 %v1151_v32  ;;  %517 = vmatpush1.bf16.msra.mxu1 %v1152_v33  ;;  %v1176_v54 = vld [vmem:[%s1376_s20 + $0xa8] sm:$0xff]   ;;  %v1177_v55 = vld [vmem:[%s1376_s20 + $0x60] sm:$0xff]   ;;  %v1181_v59 = vld [vmem:[%s1376_s20 + $0x58] sm:$0xff]  }
  0x39   : > { %477 = vmatprep.subr.bf16.mxu0 %v1153_v34  ;;  %518 = vmatprep.subr.bf16.mxu1 %v1155_v35  ;;  %v1178_v56 = vld [vmem:[%s1376_s20 + $0xe0] sm:$0xff]   ;;  %v1182_v60 = vld [vmem:[%s1376_s20 + $0xd8] sm:$0xff]   ;;  %v1185_v63 = vld [vmem:[%s1376_s20 + $0x50] sm:$0xff]  }
  0x3a   : > { %v1179_v57 = vld [vmem:[%s1376_s20 + $0x20] sm:$0xff]   ;;  %v1183_v61 = vld [vmem:[%s1376_s20 + $0x18] sm:$0xff]   ;;  %v1186_v0 = vld [vmem:[%s1376_s20 + $0xd0] sm:$0xff]  }
  0x3b   : > { %v1180_v58 = vld [vmem:[%s1376_s20 + $0xa0] sm:$0xff]   ;;  %v1184_v62 = vld [vmem:[%s1376_s20 + $0x98] sm:$0xff]   ;;  %v1187_v1 = vld [vmem:[%s1376_s20 + $0x10] sm:$0xff]  }
  0x3c   : > { %478 = vmatpush1.bf16.msra.mxu0 %v1157_v36  ;;  %519 = vmatpush1.bf16.msra.mxu1 %v1158_v37  ;;  %v1188_v2 = vld [vmem:[%s1376_s20 + $0x90] sm:$0xff]   ;;  %v1189_v3 = vld [vmem:[%s1376_s20 + $0x48] sm:$0xff]   ;;  %v1193_v7 = vld [vmem:[%s1376_s20 + $0x40] sm:$0xff]  }
  0x3d   : > { %479 = vmatprep.subr.bf16.mxu0 %v1159_v38  ;;  %520 = vmatprep.subr.bf16.mxu1 %v1161_v39  ;;  %v1190_v4 = vld [vmem:[%s1376_s20 + $0xc8] sm:$0xff]   ;;  %v1194_v8 = vld [vmem:[%s1376_s20 + $0xc0] sm:$0xff]  }
  0x3e   : > { %v1191_v5 = vld [vmem:[%s1376_s20 + $0x8] sm:$0xff]   ;;  %v1195_v9 = vld [vmem:[%s1376_s20] sm:$0xff]  }
  0x3f   : > { %v1192_v6 = vld [vmem:[%s1376_s20 + $0x88] sm:$0xff]   ;;  %v1196_v10 = vld [vmem:[%s1376_s20 + $0x80] sm:$0xff]  }
  0x40   : > { %480 = vmatpush1.bf16.msra.mxu0 %v1163_v40  ;;  %521 = vmatpush1.bf16.msra.mxu1 %v1164_v41  ;;  %v339_v15 = vld [vmem:[%s303_s14] sm:$0xf] }
  0x41   : > { %1056 = vmatprep.subr.bf16.mxu0 %v1165_v42  ;;  %1078 = vmatprep.subr.bf16.mxu1 %v1166_v43  ;;  %v344_v18 = vrot.slane %v339_v15, %v343_v13  ;;  %v352_v19 = vrot.slane %v339_v15, %v351_v14  ;;  %v348_v20 = vrot.slane %v339_v15, %v347_v16 }
  0x42   : > { %v356_v21 = vrot.slane %v339_v15, %v355_v17 }
  0x43   : > { %1015 = vmatmul.mubr.msk.bf16.vlgmr.msra.gmra.mxu0 %vm461_vm1, %v318_v44  ;;  %1016 = vmatmul.mubr.msk.bf16.vlgmr.msra.gmra.mxu1 %vm461_vm1, %v318_v44 }
  0x44   : > { %1057 = vmatpush3.bf16.msra.mxu0 %v1167_v45  ;;  %1079 = vmatpush3.bf16.msra.mxu1 %v1168_v46 }
  0x45   : > { %1058 = vmatprep.subr.bf16.mxu0 %v1169_v47  ;;  %1080 = vmatprep.subr.bf16.mxu1 %v1170_v48  ;;  %v551_v48 = vld [vmem:[#allocation2] sm:$0xff] }
  0x48   : > { %1059 = vmatpush3.bf16.msra.mxu0 %v1171_v49  ;;  %1081 = vmatpush3.bf16.msra.mxu1 %v1172_v50 }
  0x49   : > { %1060 = vmatprep.subr.bf16.mxu0 %v1173_v51  ;;  %1082 = vmatprep.subr.bf16.mxu1 %v1174_v52 }
  0x4c   : > { %1061 = vmatpush3.bf16.msra.mxu0 %v1175_v53  ;;  %1083 = vmatpush3.bf16.msra.mxu1 %v1176_v54 }
  0x4d   : > { %1062 = vmatprep.subr.bf16.mxu0 %v1177_v55  ;;  %1084 = vmatprep.subr.bf16.mxu1 %v1178_v56 }
  0x50   : > { %1063 = vmatpush3.bf16.msra.mxu0 %v1179_v57  ;;  %1085 = vmatpush3.bf16.msra.mxu1 %v1180_v58 }
  0x51   : > { %1064 = vmatprep.subr.bf16.mxu0 %v1181_v59  ;;  %1086 = vmatprep.subr.bf16.mxu1 %v1182_v60 }
  0x54   : > { %1065 = vmatpush3.bf16.msra.mxu0 %v1183_v61  ;;  %1087 = vmatpush3.bf16.msra.mxu1 %v1184_v62 }
  0x55   : > { %1066 = vmatprep.subr.bf16.mxu0 %v1185_v63  ;;  %1088 = vmatprep.subr.bf16.mxu1 %v1186_v0 }
  0x58   : > { %1067 = vmatpush3.bf16.msra.mxu0 %v1187_v1  ;;  %1089 = vmatpush3.bf16.msra.mxu1 %v1188_v2 }
  0x59   : > { %1068 = vmatprep.subr.bf16.mxu0 %v1189_v3  ;;  %1090 = vmatprep.subr.bf16.mxu1 %v1190_v4 }
  0x5c   : > { %1069 = vmatpush3.bf16.msra.mxu0 %v1191_v5  ;;  %1091 = vmatpush3.bf16.msra.mxu1 %v1192_v6 }
  0x5d   : > { %1070 = vmatprep.subr.bf16.mxu0 %v1193_v7  ;;  %1092 = vmatprep.subr.bf16.mxu1 %v1194_v8 }
  0x60   : > { %1071 = vmatpush3.bf16.msra.mxu0 %v1195_v9  ;;  %1093 = vmatpush3.bf16.msra.mxu1 %v1196_v10 }
 0x103   : > { %v499_v22 = vpop.f32.mrf.mxu0  ;;  %v540_v23 = vpop.f32.mrf.mxu1 }
 0x104   : > { %v500_v24 = vadd.f32 %v499_v22, %v344_v18  ;;  %v541_v25 = vadd.f32 %v540_v23, %v352_v19 }
 0x105   : > { %v501_v26 = vpop.f32.mrf.mxu0  ;;  %v542_v27 = vpop.f32.mrf.mxu1 }
 0x106   : > { %v502_v28 = vadd.f32 %v501_v26, %v348_v20  ;;  %v543_v29 = vadd.f32 %v542_v27, %v356_v21  ;;  %v547_v30 = vmax.f32 %v500_v24, 0.0  ;;  %v549_v31 = vmax.f32 %v541_v25, 0.0 }
 0x107   : > { %v503_v32 = vpop.f32.mrf.mxu0  ;;  %v544_v33 = vpop.f32.mrf.mxu1 }
 0x108   : > { %v548_v34 = vmax.f32 %v502_v28, 0.0  ;;  %v550_v35 = vmax.f32 %v543_v29, 0.0  ;;  %v552_v40 = vpack.c.bf16 %v547_v30, %v547_v30  ;;  %v554_v41 = vpack.c.bf16 %v549_v31, %v549_v31 }
 0x109   : > { %v504_v36 = vpop.f32.mrf.mxu0  ;;  %v545_v37 = vpop.f32.mrf.mxu1 }
 0x10a   : > { %v553_v38 = vpack.c.bf16 %v548_v34, %v548_v34  ;;  %v555_v39 = vpack.c.bf16 %v550_v35, %v550_v35 }
 0x10c   : > { %844 = vmatprep.mubr.bf16.mxu0 %v553_v38  ;;  %884 = vmatprep.mubr.bf16.mxu1 %v555_v39 }
 0x10d   : > { %845 = vmatmul.mubr.bf16.vlgmr.msra.gmra.mxu0 %v552_v40  ;;  %885 = vmatmul.mubr.bf16.vlgmr.msra.gmra.mxu1 %v554_v41 }
 0x1cd   : > { %v1072_v42 = vpop.f32.mrf.mxu0  ;;  %v1094_v43 = vpop.f32.mrf.mxu1 }
 0x1cf   : > { %v1073_v44 = vpop.f32.mrf.mxu0  ;;  %v1095_v45 = vpop.f32.mrf.mxu1 }
 0x1d0   : > { %v1074_v46 = vadd.f32 %v1073_v44, %v1072_v42  ;;  %v1096_v47 = vadd.f32 %v1095_v45, %v1094_v43 }
 0x1d1   : > { %v1075_v49 = vpop.f32.mrf.mxu0  ;;  %v1097_v50 = vpop.f32.mrf.mxu1 }
 0x1d2   : > { %v887_v51 = vadd.f32 %v1096_v47, %v1074_v46  ;;  %898 = sbr.rel (%p1049_p11) target bundleno = 485 (0x1e5), region = 71 }
 0x1d3   : > { %v1076_v52 = vpop.f32.mrf.mxu0  ;;  %v1098_v53 = vpop.f32.mrf.mxu1 }
 0x1d4   : > { %v892_v54 = vadd.f32 %v887_v51, %v551_v48 }
 0x1d6   : > { %894 = vst.msk [vmem:[#allocation2] sm:$0xff] %vm893_vm2, %v892_v54 }
 0x1d7   : > { %v1050_v56 = vld [vmem:[%s1471_s4] ss:$0 sm:$0xff]  ;;  %vm910_vm3 = vcmask 322560  }
 0x1dd   : > { %v899_v55 = vld [vmem:[#allocation2] sm:$0xff] }
 0x1de   : > { %v907_v57 = vadd.f32 %v1050_v56, %v899_v55 }
 0x1e0   : > { %v908_v58 = vmax.f32 %v907_v57, 0.0 }
 0x1e2   : > { %v909_v59 = vpack.c.bf16 %v908_v58, %v908_v58 }
 0x1e4   : > { %911 = vst.msk [vmem:[#allocation4] sm:$0xf] %vm910_vm3, %v909_v59 }
 0x1e5 PF: > { %p1106_p12 = scmp.eq.s32.totalorder %s1298_s21, 2  ;;  %s1251_s30 = smov [#allocation4]  }
 0x1e6   : > { %s919_s6 = sshll.u32 %s1251_s30, 4  ;;  %s920_s6 = int_to_ptr.vmem [resolvable:$true] %s919_s6 }
 0x1e7   : > { %s1197_s7 = scalar_lea.vmem %s920_s6, 64  ;;  %p1204_p2 = scmp.lt.s32.totalorder %s920_s6, %s920_s6 }
 0x1e8   : > { %p1198_p13 = scmp.ne.s32.totalorder %s920_s6, %s1197_s7  ;;  %p1205_p3 = scmp.lt.s32.totalorder %s1197_s7, %s1197_s7 }
 0x1ea   : > { %p1199_p0 = pnand %p1198_p13, %p1106_p12  ;;  %p1206_p4 = por %p1205_p3, %p1204_p2 }
 0x1ec   : > { %p1200_p1 = pneg %p1199_p0 }
 0x1ee   : > { %p1207_p5 = pnand %p1206_p4, %p1200_p1 }
 0x1f0   : > { %1210 = shalt.err (!%p1207_p5)
}
 0x1f1   : > { %1103 = dma.vmem_to_hbm [thread:$0]  (%p1106_p12), %s920_s6, 64, %s1472_s5, [#allocation5]  }
 0x1f2   : > { %1234 = dma.done.wait (%p1106_p12), [#allocation5], 64  }
 0x1f3   : > { %1236 = vsyncadd (%p1106_p12), [#allocation5], 4294967232 }
 0x1f4 PF: > { %p13_p6 = scmp.ge.s32.totalorder %s1301_s22, 5   ;;  %s1473_s18 = smov %s1243_s19 }
 0x1f5   : > { %s1474_s19 = smov %s1310_s25  ;;  %s1475_s20 = smov %s1301_s22 }
 0x1f6   :  { %15 = sbr.rel (!%p13_p6) target bundleno = 2 (0x2), region = 109 }
 0x1fb   :  { %932 = vsyncpa [#allocation5], 1 }
 0x1fc   :  { %934 = vsyncpa [#allocation5 + $0x1], 1 }

</bundles_post_ra>
